<compile_context>
chip_gen: v7x
topology: tpu7x:2x2x1
jax: 0.10.0
libtpu: 0.0.40
codegen_flags: <defaults>
</compile_context>

<pallas_src>
import functools

import jax
import jax.numpy as jnp
from jax.experimental import pallas as pl
from jax.experimental.pallas import tpu as pltpu

LANES = 128
MAX_BLOCK_ROWS = 4096  # (4096, 128) f32 tile = 2 MiB; ~6 MiB total VMEM w/ scratch.


def _sum_kernel(x_ref, o_ref, acc_ref, *, valid_rows_last):
    """Accumulate the f32 sum of all tiles into a resident VMEM accumulator."""
    i = pl.program_id(0)
    last = pl.num_programs(0) - 1

    @pl.when(i == 0)
    def _():
        acc_ref[...] = jnp.zeros_like(acc_ref)

    x = x_ref[...].astype(jnp.float32)

    if valid_rows_last is not None:
        # The last row-block extends past the true array extent; zero the
        # out-of-bounds rows so they do not contribute to the sum.
        row_ids = jax.lax.broadcasted_iota(jnp.int32, x.shape, 0)
        keep = jnp.logical_or(i != last, row_ids < valid_rows_last)
        x = jnp.where(keep, x, 0.0)

    acc_ref[...] += x  # pure VPU adds; kernel stays DMA-bound

    @pl.when(i == last)
    def _():
        # Single cross-sublane reduction, once, into a lane-dense output row.
        o_ref[...] = jnp.sum(acc_ref[...], axis=0, keepdims=True)


def sn_patch_gen_loss(dgz: jax.Array, weight: float = 1.0) -> jax.Array:
    """Pallas equivalent of SNPatchGenLoss.forward: -weight * mean(dgz)."""
    n_elems = dgz.size
    flat = dgz.reshape(-1)  # native dtype; copy-free reshape

    # Rare fallback: element count not a multiple of 128 lanes -> zero-pad to
    # the next lane boundary (<128 zeros; does not change the sum).  The common
    # multiple-of-128 case takes the copy-free path.
    lane_rem = n_elems % LANES
    if lane_rem:
        flat = jnp.pad(flat, (0, LANES - lane_rem))
    rows = flat.size // LANES
    x2d = flat.reshape(rows, LANES)

    # Sublane alignment of the row-block depends on dtype packing
    # (f32/i32 -> 8, bf16/f16 -> 16, int8/fp8 -> 32).
    itemsize = jnp.dtype(dgz.dtype).itemsize
    sub = 8 * max(4 // max(itemsize, 1), 1)
    if rows >= MAX_BLOCK_ROWS:
        block_rows = MAX_BLOCK_ROWS
    else:
        block_rows = (rows // sub) * sub
        if block_rows == 0:
            block_rows = rows  # block equals the full array dim (allowed)

    num_blocks = pl.cdiv(rows, block_rows)
    valid_rows_last = rows - (num_blocks - 1) * block_rows
    if valid_rows_last == block_rows:
        valid_rows_last = None  # every block fully in bounds; no masking

    kernel = functools.partial(_sum_kernel, valid_rows_last=valid_rows_last)

    # TODO(synk): on v7x, split the row range across the 2 TensorCores with a
    # leading "parallel" grid axis and per-core partial-sum slots (~2x there).
    out = pl.pallas_call(
        kernel,
        out_shape=jax.ShapeDtypeStruct((1, LANES), jnp.float32),
        grid_spec=pltpu.PrefetchScalarGridSpec(
            num_scalar_prefetch=0,
            grid=(num_blocks,),
            in_specs=[pl.BlockSpec((block_rows, LANES), lambda i: (i, 0))],
            out_specs=pl.BlockSpec((1, LANES), lambda i: (0, 0)),
            scratch_shapes=[pltpu.VMEM((block_rows, LANES), jnp.float32)],
        ),
        compiler_params=pltpu.CompilerParams(
            dimension_semantics=("arbitrary",),  # reduction axis; output resident
        ),
    )(x2d)

    # Final lane reduce + scale outside the kernel: one scalar-ish op, and it
    # keeps a single compiled kernel across different weight values.
    return (-1.0 * weight / n_elems) * jnp.sum(out)


if __name__ == "__main__":
    key = jax.random.PRNGKey(0)
    weight = 1.0

    # Discriminator patch output for a fake image batch, NCHW.
    dgz = jax.random.normal(key, (2, 4, 16, 16), dtype=jnp.float32)
    loss = sn_patch_gen_loss(dgz, weight=weight)
    jax.block_until_ready(loss)
    ref = -1.0 * weight * jnp.mean(dgz)
    assert jnp.allclose(loss, ref, rtol=1e-5, atol=1e-6), (loss, ref)

    # Multi-block path (grid > 1, aligned).
    k1, k2 = jax.random.split(key)
    dgz_big = jax.random.normal(k1, (8, 16, 128, 128), dtype=jnp.float32)
    loss_big = sn_patch_gen_loss(dgz_big, weight=0.5)
    jax.block_until_ready(loss_big)
    ref_big = -1.0 * 0.5 * jnp.mean(dgz_big)
    assert jnp.allclose(loss_big, ref_big, rtol=1e-5, atol=1e-6), (loss_big, ref_big)

    # Unaligned size: exercises the lane-pad fallback and in-kernel row masking.
    dgz_odd = jax.random.normal(k2, (2, 4, 30, 30), dtype=jnp.float32)
    loss_odd = sn_patch_gen_loss(dgz_odd, weight=2.0)
    jax.block_until_ready(loss_odd)
    ref_odd = -1.0 * 2.0 * jnp.mean(dgz_odd)
    assert jnp.allclose(loss_odd, ref_odd, rtol=1e-5, atol=1e-6), (loss_odd, ref_odd)

    print("KERNEL_OK")
</pallas_src>

<mosaic_0001>
module attributes {stable_mosaic.version = 11 : i64} {
  func.func @_sum_kernel(%arg0: i32, %arg1: memref<16x128xf32, #tpu.memory_space<vmem>>, %arg2: memref<1x128xf32, #tpu.memory_space<vmem>>, %arg3: memref<16x128xf32, #tpu.memory_space<vmem>>) attributes {dimension_semantics = [#tpu.dimension_semantics<arbitrary>], iteration_bounds = array<i64: 1>, scalar_prefetch = 0 : i64, scratch_operands = 1 : i64, tpu.core_type = #tpu.core_type<tc>, window_params = [{transform_indices = @transform_0, window_bounds = array<i64: 16, 128>}, {pipeline_mode = #tpu.pipeline_mode<synchronous>, transform_indices = @transform_1, window_bounds = array<i64: 1, 128>}]} {
    %c0_i32 = arith.constant 0 : i32
    %0 = arith.cmpi eq, %arg0, %c0_i32 : i32
    %1 = arith.extui %0 : i1 to i32
    %c0_i32_0 = arith.constant 0 : i32
    %2 = arith.cmpi ne, %1, %c0_i32_0 : i32
    scf.if %2 {
      %cst = arith.constant 0.000000e+00 : f32
      %10 = vector.broadcast %cst : f32 to vector<16x128xf32>
      %c0_8 = arith.constant 0 : index
      %c0_9 = arith.constant 0 : index
      %11 = vector.load %arg3[%c0_8, %c0_9] : memref<16x128xf32, #tpu.memory_space<vmem>>, vector<16x128xf32>
      tpu.vector_store %arg3[%c0_8, %c0_9], %10 {strides = array<i32>} : memref<16x128xf32, #tpu.memory_space<vmem>>, vector<16x128xf32>,
    } else {
    }
    %c0 = arith.constant 0 : index
    %c0_1 = arith.constant 0 : index
    %3 = vector.load %arg1[%c0, %c0_1] : memref<16x128xf32, #tpu.memory_space<vmem>>, vector<16x128xf32>
    %c0_2 = arith.constant 0 : index
    %c0_3 = arith.constant 0 : index
    %4 = vector.load %arg3[%c0_2, %c0_3] : memref<16x128xf32, #tpu.memory_space<vmem>>, vector<16x128xf32>
    %5 = arith.addf %4, %3 : vector<16x128xf32>
    %c0_4 = arith.constant 0 : index
    %c0_5 = arith.constant 0 : index
    %6 = vector.load %arg3[%c0_4, %c0_5] : memref<16x128xf32, #tpu.memory_space<vmem>>, vector<16x128xf32>
    tpu.vector_store %arg3[%c0_4, %c0_5], %5 {strides = array<i32>} : memref<16x128xf32, #tpu.memory_space<vmem>>, vector<16x128xf32>,
    %c0_i32_6 = arith.constant 0 : i32
    %7 = arith.cmpi eq, %arg0, %c0_i32_6 : i32
    %8 = arith.extui %7 : i1 to i32
    %c0_i32_7 = arith.constant 0 : i32
    %9 = arith.cmpi ne, %8, %c0_i32_7 : i32
    scf.if %9 {
      %c0_8 = arith.constant 0 : index
      %c0_9 = arith.constant 0 : index
      %10 = vector.load %arg3[%c0_8, %c0_9] : memref<16x128xf32, #tpu.memory_space<vmem>>, vector<16x128xf32>
      %cst = arith.constant dense<0.000000e+00> : vector<128xf32>
      %11 = vector.multi_reduction <add>, %10, %cst [0] : vector<16x128xf32> to vector<128xf32>
      %12 = vector.shape_cast %11 : vector<128xf32> to vector<1x128xf32>
      %c0_10 = arith.constant 0 : index
      %c0_11 = arith.constant 0 : index
      %13 = vector.load %arg2[%c0_10, %c0_11] : memref<1x128xf32, #tpu.memory_space<vmem>>, vector<1x128xf32>
      tpu.vector_store %arg2[%c0_10, %c0_11], %12 {strides = array<i32>} : memref<1x128xf32, #tpu.memory_space<vmem>>, vector<1x128xf32>,
    } else {
    }
    return
  }
  func.func @transform_0(%arg0: i32) -> (i32, i32) {
    %c0_i32 = arith.constant 0 : i32
    %c0_i32_0 = arith.constant 0 : i32
    return %arg0, %c0_i32 : i32, i32
  }
  func.func @transform_1(%arg0: i32) -> (i32, i32) {
    %c0_i32 = arith.constant 0 : i32
    %c0_i32_0 = arith.constant 0 : i32
    %c0_i32_1 = arith.constant 0 : i32
    return %c0_i32, %c0_i32_0 : i32, i32
  }
}

</mosaic_0001>

<bundles_post_ra>
// kernel: tpu_custom_call.1
= control target key start
LH: loop header
LB: loop body
LE: loop exit
PB: predicated region body
PF: predicated region fallthrough
CT: control target
= control target key end

     0   :  { %6 = vsyncpa [#allocation4], 0  ;;  %s155_s0 = inlined_call_operand.hbm [shape: f32[16,128], index: 0, kind: input, shape index: {}]   ;;  %s156_s1 = inlined_call_operand.hbm [shape: f32[1,128], index: 1, kind: output, shape index: {}]  }
   0x1   :  { %7 = vsyncpa [#allocation5], 0  ;;  %s117_s6 = smov [#allocation3]   ;;  %s69_s10 = scalar_lea.hbm %s155_s0, 256 }
   0x2   :  { %s13_s7 = sshll.u32 %s117_s6, 4  ;;  %p70_p0 = scmp.ne.s32.totalorder %s155_s0, %s69_s10  ;;  %s14_s7 = int_to_ptr.vmem [resolvable:$true] %s13_s7 }
   0x3   :  { %p73_p1 = scmp.lt.u32.totalorder %s69_s10, %s155_s0 }
   0x5   :  { %p75_p2 = pnand %p73_p1, %p70_p0 }
   0x7   :  { %78 = shalt.err (!%p75_p2)
}
   0x8   :  { %s79_s15 = scalar_lea.vmem %s14_s7, 256  ;;  %p84_p4 = scmp.lt.s32.totalorder %s14_s7, %s14_s7 }
   0x9   :  { %p80_p3 = scmp.ne.s32.totalorder %s14_s7, %s79_s15  ;;  %p85_p5 = scmp.lt.s32.totalorder %s79_s15, %s79_s15 }
   0xb   :  { %p86_p6 = por %p85_p5, %p84_p4 }
   0xd   :  { %p87_p7 = pnand %p86_p6, %p80_p3 }
   0xf   :  { %90 = shalt.err (!%p87_p7)
}
  0x10   :  { %s118_s16 = smov 128   ;;  %s119_s17 = smov 8  }
  0x11   :  { %19 = dma.hbm_to_vmem [thread:$0]  %s155_s0, 256, %s14_s7, [#allocation4], %s118_s16, %s118_s16, %s119_s17  }
  0x12   :  { %113 = dma.done.wait [#allocation4], 256  }
  0x13   :  { %114 = vsyncadd [#allocation4], 4294967040  ;;  %v29_v0 = vld [vmem:[#allocation3] sm:$0xff]  ;;  %v30_v1 = vld [vmem:[#allocation3 + $0x8] sm:$0xff]  ;;  %s120_s20 = smov [#allocation6]  }
  0x14   :  { %v42_v2 = vadd.f32 %v30_v1, %v29_v0  ;;  %s56_s21 = sshll.u32 %s120_s20, 4  ;;  %s57_s21 = int_to_ptr.vmem [resolvable:$true] %s56_s21 }
  0x15   :  { %s91_s22 = scalar_lea.vmem %s57_s21, 16  ;;  %s95_s23 = scalar_lea.vmem %s57_s21, 32 }
  0x16   :  { %v43_v3 = vrot.slane %v42_v2, 4  ;;  %p92_p8 = scmp.ne.s32.totalorder %s57_s21, %s91_s22  ;;  %p96_p9 = scmp.lt.s32.totalorder %s57_s21, %s57_s21 }
  0x17   :  { %p97_p10 = scmp.lt.s32.totalorder %s95_s23, %s91_s22 }
  0x18   :  { %v44_v4 = vadd.f32 %v43_v3, %v42_v2 }
  0x19   :  { %p98_p11 = por %p97_p10, %p96_p9 }
  0x1a   :  { %v45_v5 = vrot.slane %v44_v4, 2 }
  0x1b   :  { %p99_p12 = pnand %p98_p11, %p92_p8 }
  0x1c   :  { %v46_v6 = vadd.f32 %v45_v5, %v44_v4 }
  0x1e   :  { %v47_v7 = vrot.slane %v46_v6, 1 }
  0x20   :  { %v48_v8 = vadd.f32 %v47_v7, %v46_v6 }
  0x22   :  { %49 = vst [vmem:[#allocation6] sm:$0x1] %v48_v8 }
  0x23   :  { %102 = shalt.err (!%p99_p12)
}
  0x24   :  { %s103_s25 = scalar_lea.hbm %s156_s1, 16 }
  0x25   :  { %p104_p13 = scmp.ne.s32.totalorder %s156_s1, %s103_s25  ;;  %p107_p0 = scmp.lt.u32.totalorder %s103_s25, %s156_s1 }
  0x27   :  { %p109_p1 = pnand %p107_p0, %p104_p13 }
  0x29   :  { %112 = shalt.err (!%p109_p1)
}
  0x2a   :  { %59 = dma.vmem_to_hbm [thread:$0]  %s57_s21, 16, %s156_s1, [#allocation5]  }
  0x2b   :  { %115 = dma.done.wait [#allocation5], 16  }
  0x2c   :  { %116 = vsyncadd [#allocation5], 4294967280 }
  0x2d   :  { %63 = vsyncpa [#allocation4], 1 }
  0x2e   :  { %64 = vsyncpa [#allocation5], 1 }

</bundles_post_ra>
